<compile_context>
chip_gen: v6e
topology: v6e:2x2x1
jax: 0.10.0
libtpu: 0.0.40
codegen_flags: <defaults>
</compile_context>

<pallas_src>
import jax
import jax.numpy as jnp
from jax.experimental import pallas as pl
from jax.experimental.pallas import tpu as pltpu


def _round_up(x, m):
    return ((x + m - 1) // m) * m


def _pick_tile_div(size_aligned, t_max):
    """Largest multiple of 128 <= t_max that divides size_aligned (a 128-multiple)."""
    t = max(128, (min(t_max, size_aligned) // 128) * 128)
    while size_aligned % t != 0:
        t -= 128
    return t


# ---------------------------------------------------------------------------
# Kernels
# ---------------------------------------------------------------------------
def linear_kernel(x_ref, wt_ref, b_ref, o_ref, acc_ref):
    """K-reduction kernel: f32 accumulator in VMEM scratch, bias folded into init."""
    k = pl.program_id(2)  # K MUST be the innermost grid axis (see note above).

    @pl.when(k == 0)
    def _():
        # Fold bias into the accumulator init (saves one tm x tn VPU add later).
        acc_ref[...] = jnp.broadcast_to(
            b_ref[...].astype(jnp.float32), acc_ref.shape
        )

    # bf16 x bf16 -> f32 on the MXU.
    acc_ref[...] += jnp.dot(
        x_ref[...], wt_ref[...], preferred_element_type=jnp.float32
    )

    @pl.when(k == pl.num_programs(2) - 1)
    def _():
        o_ref[...] = acc_ref[...].astype(o_ref.dtype)


def linear_kernel_single_k(x_ref, wt_ref, b_ref, o_ref):
    """Specialized path when Kp // tk == 1: no scratch round-trip."""
    o_ref[...] = (
        jnp.dot(x_ref[...], wt_ref[...], preferred_element_type=jnp.float32)
        + b_ref[...].astype(jnp.float32)
    ).astype(o_ref.dtype)


# ---------------------------------------------------------------------------
# Parameter preparation (init-time; do NOT run per forward call)
# ---------------------------------------------------------------------------
def prepare_linear_params(weight, bias, *, tn_max=512, tk_max=512,
                          compute_dtype=jnp.bfloat16):
    """Transpose nn.Linear weight (N, K) -> (K, N), pad K/N to tile multiples,
    and cast to the MXU compute dtype.  Done once at init so the forward pass
    never pays a per-call HBM round-trip for transpose/pad of the weight."""
    N, K = weight.shape
    Kp = _round_up(K, 128)
    Np = _round_up(N, 128)
    tk = _pick_tile_div(Kp, tk_max)
    tn = _pick_tile_div(Np, tn_max)

    wt = weight.T  # (K, N)
    if (Kp, Np) != (K, N):
        wt = jnp.pad(wt, ((0, Kp - K), (0, Np - N)))
    wt = wt.astype(compute_dtype)

    b2 = bias.reshape(1, N).astype(jnp.float32)  # bias stays f32 (added to f32 acc)
    if Np != N:
        b2 = jnp.pad(b2, ((0, 0), (0, Np - N)))

    return {"wt": wt, "bias": b2, "tn": tn, "tk": tk, "K": K, "N": N}


# ---------------------------------------------------------------------------
# Forward
# ---------------------------------------------------------------------------
def linear_forward(x, params, *, tm_max=512, compute_dtype=jnp.bfloat16):
    """y = x @ W^T + b using the prepared (padded, transposed, bf16) weight."""
    wt, b2 = params["wt"], params["bias"]
    tn, tk, K, N = params["tn"], params["tk"], params["K"], params["N"]
    Kp, Np = wt.shape

    M, Kx = x.shape
    assert Kx == K, (Kx, K)
    out_dtype = x.dtype

    # M tile: minimize padding for awkward batch sizes (e.g. M=300 -> tm=304).
    n_m = -(-M // tm_max)
    tm = _round_up(-(-M // n_m), 8)
    Mp = _round_up(M, tm)

    # v7x megacore: if the parallel grid would be a single output tile, split N
    # so both TensorCores get work (tn stays a 128-multiple dividing Np).
    if Mp // tm == 1 and Np // tn == 1 and Np % 256 == 0:
        tn = Np // 2

    # Per-call activation pad + bf16 cast (weight already padded/cast at init).
    if (Mp, Kp) != (M, K):
        x = jnp.pad(x, ((0, Mp - M), (0, Kp - K)))
    x = x.astype(compute_dtype)

    grid = (Mp // tm, Np // tn, Kp // tk)  # K reduction is the LAST grid axis.
    kt = grid[2]

    # VMEM working-set estimate (double-buffered bf16 inputs, out tile, f32 acc).
    cd_bytes = jnp.dtype(compute_dtype).itemsize
    out_bytes = jnp.dtype(out_dtype).itemsize
    est = (2 * (tm * tk + tk * tn) * cd_bytes
           + 2 * tm * tn * out_bytes
           + tm * tn * 4
           + 2 * tn * 4)
    vmem_limit = None
    if est > 12 * 1024 * 1024:
        # Raise the scoped-VMEM limit only when needed; cap below v7x's 64 MiB
        # physical per-TensorCore VMEM so a v6e-tuned tile sweep cannot OOM there.
        vmem_limit = min(int(est * 1.5), 48 * 1024 * 1024)

    if kt == 1:
        kernel = linear_kernel_single_k
        scratch_shapes = []
    else:
        kernel = linear_kernel
        scratch_shapes = [pltpu.VMEM((tm, tn), jnp.float32)]

    # TODO(synk): for very memory-bound shapes (tiny M, huge K*N), sweep
    # pipeline_mode=pl.Buffered(3) on the x / wt BlockSpecs; and consider int8
    # weights on v5e/v6e vs fp8 weights on v7x for quantized serving.
    out = pl.pallas_call(
        kernel,
        out_shape=jax.ShapeDtypeStruct((Mp, Np), out_dtype),
        grid_spec=pltpu.PrefetchScalarGridSpec(
            num_scalar_prefetch=0,
            grid=grid,
            in_specs=[
                pl.BlockSpec((tm, tk), lambda i, j, k: (i, k)),   # activations
                pl.BlockSpec((tk, tn), lambda i, j, k: (k, j)),   # weight (K, N)
                pl.BlockSpec((1, tn), lambda i, j, k: (0, j)),    # bias
            ],
            out_specs=pl.BlockSpec((tm, tn), lambda i, j, k: (i, j)),
            scratch_shapes=scratch_shapes,
        ),
        compiler_params=pltpu.CompilerParams(
            dimension_semantics=("parallel", "parallel", "arbitrary"),
            vmem_limit_bytes=vmem_limit,
        ),
    )(x, wt, b2)

    if (Mp, Np) != (M, N):
        out = out[:M, :N]
    return out


# ---------------------------------------------------------------------------
# Init matching the PyTorch module
# ---------------------------------------------------------------------------
def kaiming_normal(key, out_features, in_features, dtype=jnp.float32):
    # nn.init.kaiming_normal_ defaults: fan_in mode, leaky_relu a=0
    # => gain = sqrt(2), std = gain / sqrt(fan_in)
    std = jnp.sqrt(2.0 / in_features)
    return (jax.random.normal(key, (out_features, in_features), dtype) * std).astype(dtype)


if __name__ == "__main__":
    key = jax.random.PRNGKey(0)

    # --- Test 1: the module's small demo shape (single-K-step specialization) ---
    in_features, out_features, batch = 32, 64, 8
    k_x, k_w, key = jax.random.split(key, 3)
    x = jax.random.normal(k_x, (batch, in_features), jnp.float32)
    weight = kaiming_normal(k_w, out_features, in_features)   # (out, in), like nn.Linear
    bias = jnp.zeros((out_features,), jnp.float32)            # constant 0 init

    params = prepare_linear_params(weight, bias)              # init-time transpose/pad/cast
    y = linear_forward(x, params)
    jax.block_until_ready(y)

    y_ref = x @ weight.T + bias
    assert y.shape == (batch, out_features)
    # bf16 operands with f32 accumulation: loosen the tolerance vs the f32 reference.
    assert jnp.allclose(y, y_ref, atol=5e-2, rtol=5e-2)

    # --- Test 2: exercise the K-reduction accumulator path (kt > 1) ---
    in2, out2, batch2 = 256, 192, 48
    k_x2, k_w2, _ = jax.random.split(key, 3)
    x2 = jax.random.normal(k_x2, (batch2, in2), jnp.float32)
    w2 = kaiming_normal(k_w2, out2, in2)
    b2 = jnp.zeros((out2,), jnp.float32)
    params2 = prepare_linear_params(w2, b2, tn_max=128, tk_max=128)  # force 2 K steps
    y2 = linear_forward(x2, params2)
    jax.block_until_ready(y2)
    y2_ref = x2 @ w2.T + b2
    assert y2.shape == (batch2, out2)
    assert jnp.allclose(y2, y2_ref, atol=5e-2, rtol=5e-2)

    print("KERNEL_OK")
</pallas_src>

<mosaic_0001>
module attributes {stable_mosaic.version = 11 : i64} {
  func.func @linear_kernel_single_k(%arg0: i32, %arg1: i32, %arg2: i32, %arg3: memref<8x128xbf16, #tpu.memory_space<vmem>>, %arg4: memref<128x128xbf16, #tpu.memory_space<vmem>>, %arg5: memref<1x128xf32, #tpu.memory_space<vmem>>, %arg6: memref<8x128xf32, #tpu.memory_space<vmem>>) attributes {dimension_semantics = [#tpu.dimension_semantics<parallel>, #tpu.dimension_semantics<parallel>, #tpu.dimension_semantics<arbitrary>], iteration_bounds = array<i64: 1, 1, 1>, scalar_prefetch = 0 : i64, scratch_operands = 0 : i64, tpu.core_type = #tpu.core_type<tc>, window_params = [{transform_indices = @transform_0, window_bounds = array<i64: 8, 128>}, {transform_indices = @transform_1, window_bounds = array<i64: 128, 128>}, {transform_indices = @transform_2, window_bounds = array<i64: 1, 128>}, {transform_indices = @transform_3, window_bounds = array<i64: 8, 128>}]} {
    %c0 = arith.constant 0 : index
    %c0_0 = arith.constant 0 : index
    %0 = vector.load %arg3[%c0, %c0_0] : memref<8x128xbf16, #tpu.memory_space<vmem>>, vector<8x128xbf16>
    %c0_1 = arith.constant 0 : index
    %c0_2 = arith.constant 0 : index
    %1 = vector.load %arg4[%c0_1, %c0_2] : memref<128x128xbf16, #tpu.memory_space<vmem>>, vector<128x128xbf16>
    %cst = arith.constant dense<0.000000e+00> : vector<8x128xf32>
    %2 = tpu.matmul %0, %1, %cst {dimension_numbers = #tpu.dot_dimension_numbers<[1], [0], [0], [1], [0, 0, 1, 1], [], []>} : vector<8x128xbf16>, vector<128x128xbf16>, vector<8x128xf32> -> vector<8x128xf32>
    %c0_3 = arith.constant 0 : index
    %c0_4 = arith.constant 0 : index
    %3 = vector.load %arg5[%c0_3, %c0_4] : memref<1x128xf32, #tpu.memory_space<vmem>>, vector<1x128xf32>
    %4 = vector.broadcast %3 : vector<1x128xf32> to vector<8x128xf32>
    %5 = arith.addf %2, %4 : vector<8x128xf32>
    %c0_5 = arith.constant 0 : index
    %c0_6 = arith.constant 0 : index
    %6 = vector.load %arg6[%c0_5, %c0_6] : memref<8x128xf32, #tpu.memory_space<vmem>>, vector<8x128xf32>
    tpu.vector_store %arg6[%c0_5, %c0_6], %5 {strides = array<i32>} : memref<8x128xf32, #tpu.memory_space<vmem>>, vector<8x128xf32>,
    return
  }
  func.func @transform_0(%arg0: i32, %arg1: i32, %arg2: i32) -> (i32, i32) {
    %c0_i32 = arith.constant 0 : i32
    return %arg0, %arg2 : i32, i32
  }
  func.func @transform_1(%arg0: i32, %arg1: i32, %arg2: i32) -> (i32, i32) {
    %c0_i32 = arith.constant 0 : i32
    return %arg2, %arg1 : i32, i32
  }
  func.func @transform_2(%arg0: i32, %arg1: i32, %arg2: i32) -> (i32, i32) {
    %c0_i32 = arith.constant 0 : i32
    %c0_i32_0 = arith.constant 0 : i32
    return %c0_i32, %arg1 : i32, i32
  }
  func.func @transform_3(%arg0: i32, %arg1: i32, %arg2: i32) -> (i32, i32) {
    %c0_i32 = arith.constant 0 : i32
    return %arg0, %arg1 : i32, i32
  }
}

</mosaic_0001>

<bundles_post_ra>
// kernel: tpu_custom_call.1
= control target key start
LH: loop header
LB: loop body
LE: loop exit
PB: predicated region body
PF: predicated region fallthrough
CT: control target
= control target key end

     0   :  { %8 = vsyncpa [#allocation3], 0  ;;  %s329_s0 = inlined_call_operand.hbm [shape: bf16[8,128], index: 0, kind: input, shape index: {}]   ;;  %s330_s1 = inlined_call_operand.hbm [shape: bf16[128,128], index: 1, kind: input, shape index: {}]   ;;  %s331_s2 = inlined_call_operand.vmem [shape: f32[1,128], index: 2, kind: input, shape index: {}]   ;;  %s332_s3 = inlined_call_operand.hbm [shape: f32[8,128], index: 3, kind: output, shape index: {}]  }
   0x1   :  { %9 = vsyncpa [#allocation6], 0 }
   0x2   :  { %10 = vsyncpa [#allocation4], 0  ;;  %s290_s12 = smov [#allocation2]   ;;  %s291_s14 = smov [#allocation5]  }
   0x3   :  { %s17_s13 = sshll.u32 %s290_s12, 4  ;;  %s26_s15 = sshll.u32 %s291_s14, 4  ;;  %s18_s13 = int_to_ptr.vmem [resolvable:$true] %s17_s13  ;;  %s27_s15 = int_to_ptr.vmem [resolvable:$true] %s26_s15 }
   0x4   :  { %s232_s16 = scalar_lea.vmem %s18_s13, 64  ;;  %p237_p1 = scmp.lt.s32.totalorder %s18_s13, %s18_s13 }
   0x5   :  { %p233_p0 = scmp.ne.s32.totalorder %s18_s13, %s232_s16  ;;  %p238_p2 = scmp.lt.s32.totalorder %s232_s16, %s232_s16 }
   0x7   :  { %p239_p3 = por %p238_p2, %p237_p1 }
   0x9   :  { %p240_p4 = pnand %p239_p3, %p233_p0 }
   0xb   :  { %243 = shalt.err (!%p240_p4)
}
   0xc   :  { %20 = dma.hbm_to_vmem [thread:$0]  %s329_s0, 64, %s18_s13, [#allocation3]  }
   0xd   :  { %s252_s19 = scalar_lea.vmem %s27_s15, 1024  ;;  %p257_p6 = scmp.lt.s32.totalorder %s27_s15, %s27_s15 }
   0xe   :  { %p253_p5 = scmp.ne.s32.totalorder %s27_s15, %s252_s19  ;;  %p258_p7 = scmp.lt.s32.totalorder %s252_s19, %s252_s19 }
  0x10   :  { %p259_p8 = por %p258_p7, %p257_p6 }
  0x12   :  { %p260_p9 = pnand %p259_p8, %p253_p5 }
  0x14   :  { %263 = shalt.err (!%p260_p9)
}
  0x15   :  { %s292_s20 = smov 64   ;;  %s293_s21 = smov 4  }
  0x16   :  { %32 = dma.hbm_to_vmem [thread:$0]  %s330_s1, 1024, %s27_s15, [#allocation6], %s292_s20, %s292_s20, %s293_s21  }
  0x17   :  { %284 = dma.done.wait [#allocation3], 64  }
  0x18   :  { %285 = vsyncadd [#allocation3], 4294967232 }
  0x19   :  { %286 = dma.done.wait [#allocation6], 1024  }
  0x1a   :  { %287 = vsyncadd [#allocation6], 4294966272  ;;  %v294_v0 = vmov 0.0   ;;  %vm295_vm0 = vmmov 0   ;;  %v216_v1 = vld [vmem:[#allocation5 + $0x38] sm:$0xff]   ;;  %v217_v2 = vld [vmem:[#allocation5 + $0x30] sm:$0xff]  }
  0x1b   :  { %189 = vmatprep.subr.bf16.mxu0 %v294_v0  ;;  %205 = vmatprep.mubr.msk.bf16.mxu0 %vm295_vm0, %v294_v0  ;;  %v218_v3 = vld [vmem:[#allocation5 + $0x28] sm:$0xff]   ;;  %v219_v4 = vld [vmem:[#allocation5 + $0x20] sm:$0xff]   ;;  %v220_v5 = vld [vmem:[#allocation5 + $0x18] sm:$0xff]   ;;  %s296_s24 = smov [#allocation7]  }
  0x1c   :  { %190 = vmatpush3.bf16.msra.mxu0 %v216_v1  ;;  %v221_v6 = vld [vmem:[#allocation5 + $0x10] sm:$0xff]   ;;  %v222_v7 = vld [vmem:[#allocation5 + $0x8] sm:$0xff]   ;;  %v223_v8 = vld [vmem:[#allocation5] sm:$0xff]   ;;  %s161_s25 = sshll.u32 %s296_s24, 4  ;;  %s162_s25 = int_to_ptr.vmem [resolvable:$true] %s161_s25 }
  0x1d   :  { %191 = vmatprep.subr.bf16.mxu0 %v294_v0  ;;  %v42_v9 = vld [vmem:[#allocation2] sm:$0xf]  ;;  %s264_s26 = scalar_lea.vmem %s162_s25, 128  ;;  %p269_p11 = scmp.lt.s32.totalorder %s162_s25, %s162_s25 }
  0x1e   :  { %v171_v10 = vld [vmem:[%s331_s2] ss:$0 sm:$0xff]  ;;  %p265_p10 = scmp.ne.s32.totalorder %s162_s25, %s264_s26  ;;  %p270_p12 = scmp.lt.s32.totalorder %s264_s26, %s264_s26 }
  0x20   :  { %192 = vmatpush3.bf16.msra.mxu0 %v217_v2  ;;  %p271_p13 = por %p270_p12, %p269_p11 }
  0x21   :  { %193 = vmatprep.subr.bf16.mxu0 %v294_v0 }
  0x22   :  { %p272_p0 = pnand %p271_p13, %p265_p10 }
  0x24   :  { %194 = vmatpush3.bf16.msra.mxu0 %v218_v3 }
  0x25   :  { %195 = vmatprep.subr.bf16.mxu0 %v294_v0 }
  0x28   :  { %196 = vmatpush3.bf16.msra.mxu0 %v219_v4 }
  0x29   :  { %197 = vmatprep.subr.bf16.mxu0 %v294_v0 }
  0x2c   :  { %198 = vmatpush3.bf16.msra.mxu0 %v220_v5 }
  0x2d   :  { %199 = vmatprep.subr.bf16.mxu0 %v294_v0 }
  0x30   :  { %200 = vmatpush3.bf16.msra.mxu0 %v221_v6 }
  0x31   :  { %201 = vmatprep.subr.bf16.mxu0 %v294_v0 }
  0x34   :  { %202 = vmatpush3.bf16.msra.mxu0 %v222_v7 }
  0x35   :  { %203 = vmatprep.subr.bf16.mxu0 %v294_v0 }
  0x38   :  { %204 = vmatpush3.bf16.msra.mxu0 %v223_v8 }
  0x3b   :  { %206 = vmatmul.mubr.bf16.vlgmr.msra.gmra.mxu0 %v42_v9 }
  0xfb   :  { %v148_v11 = vpop.f32.mrf.mxu0 }
  0xfc   :  { %v149_v12 = vadd.f32 %v171_v10, %v148_v11 }
  0xfd   :  { %v207_v13 = vpop.f32.mrf.mxu0 }
  0xfe   :  { %154 = vst [vmem:[#allocation7] sm:$0xff] %v149_v12 }
  0xff   :  { %v151_v14 = vpop.f32.mrf.mxu0 }
 0x100   :  { %275 = shalt.err (!%p272_p0)
}
 0x101   :  { %164 = dma.vmem_to_hbm [thread:$0]  %s162_s25, 128, %s332_s3, [#allocation4]   ;;  %v208_v15 = vpop.f32.mrf.mxu0 }
 0x102   :  { %288 = dma.done.wait [#allocation4], 128  }
 0x103   :  { %289 = vsyncadd [#allocation4], 4294967168 }
 0x104   :  { %168 = vsyncpa [#allocation3], 1 }
 0x105   :  { %169 = vsyncpa [#allocation6], 1 }
 0x106   :  { %170 = vsyncpa [#allocation4], 1 }

</bundles_post_ra>
